<compile_context>
chip_gen: v7x
topology: tpu7x:2x2x1
jax: 0.10.0
libtpu: 0.0.40
codegen_flags: <defaults>
</compile_context>

<pallas_src>
import functools

import jax
import jax.numpy as jnp
from jax.experimental import pallas as pl
from jax.experimental.pallas import tpu as pltpu


def _make_kernel(C_in, C_out, L, TB, matmul_dtype):
    N = TB * L
    use_roll = (N % 128 == 0)  # lane-rotate path only for 128-aligned tiles

    def kernel(x_ref, w1_ref, w2_ref, b1_ref, b2_ref, o_ref):
        # x_ref : (C_in, N)        lane-dense activation tile (N = TB*L)
        # w1_ref: (C_out, 3*C_in)  conv1 weights, taps fused, bn1 scale folded
        # w2_ref: (C_out, 3*C_out) conv2 weights, taps fused, bn2 scale folded
        # b1_ref: (C_out, 1)       bn1 shift
        # b2_ref: (C_out, 1)       bn2 shift
        # o_ref : (C_out, N)
        x = x_ref[...].astype(jnp.float32)                       # (C_in, N)

        # Position within each batch element; used to zero the conv halo at
        # both the sequence ends and the internal batch boundaries.
        pos = jax.lax.broadcasted_iota(jnp.int32, (C_out, N), 1) % L
        not_first = pos != 0
        not_last = pos != (L - 1)

        def halo_stack(a):
            # a: (C, N) f32 -> (3*C, N): rows [a[l-1]; a[l]; a[l+1]], zero halo.
            if use_roll:
                prev = pltpu.roll(a, 1, axis=1)        # prev[:, l] = a[:, l-1]
                nxt = pltpu.roll(a, N - 1, axis=1)     # nxt[:, l]  = a[:, l+1]
            else:
                z = jnp.zeros_like(a[:, :1])
                prev = jnp.concatenate([z, a[:, :N - 1]], axis=1)
                nxt = jnp.concatenate([a[:, 1:], z], axis=1)
            prev = jnp.where(not_first, prev, 0.0)
            nxt = jnp.where(not_last, nxt, 0.0)
            return jnp.concatenate([prev, a, nxt], axis=0)       # (3*C, N)

        w1 = w1_ref[...].astype(matmul_dtype)
        w2 = w2_ref[...].astype(matmul_dtype)

        # ---- conv1 (+ folded bn1) as one fused-tap matmul over the whole tile ----
        xs = halo_stack(x)                                       # (3*C_in, N)
        h = jnp.dot(w1, xs.astype(matmul_dtype),
                    preferred_element_type=jnp.float32) + b1_ref[...]
        h = jnp.maximum(h, 0.0)
        # dropout: inference mode -> identity

        # ---- conv2 (+ folded bn2) ----
        hs = halo_stack(h)                                       # (3*C_out, N)
        out = jnp.dot(w2, hs.astype(matmul_dtype),
                      preferred_element_type=jnp.float32) + b2_ref[...]

        # ---- residual add (C_in == C_out, stride=1, downsample=None) + relu ----
        o_ref[...] = jnp.maximum(out + x, 0.0).astype(o_ref.dtype)

    return kernel


def _pick_tb(B, L, C_in, C_out):
    """Batch elements per grid step.

    Constraints / preferences:
      * TB divides B.
      * TB*L is a multiple of 128 (lane-dense blocks) OR TB == B (full extent).
      * Working set fits a conservative VMEM budget.
      * Prefer >= 2 grid steps (pipelining / v7x TCs), an even step count
        (v7x has 2 TensorCores), then the largest TB (amortize per-step cost).
    """
    budget = 20 * 1024 * 1024  # bytes; conservative vs. 32 MiB scoped VMEM limit
    # rough f32 working set per batch element: x, xs, h, hs, out + dbl-buffered I/O
    per_elem = max(1, (5 * C_in + 7 * C_out) * L * 4)
    max_tb = max(1, budget // per_elem)

    candidates = [tb for tb in range(1, B + 1)
                  if B % tb == 0 and tb <= max_tb
                  and (tb == B or (tb * L) % 128 == 0)]
    if not candidates:
        candidates = [B]  # degenerate fallback: single full block

    def score(tb):
        steps = B // tb
        return (steps >= 2, steps % 2 == 0, tb)

    return max(candidates, key=score)


@functools.partial(jax.jit, static_argnames=("use_bf16_matmul",))
def residual_block_pallas(x_ncl, w1f, b1, w2f, b2, use_bf16_matmul=False):
    """x_ncl: (B, C, L) float32 in PyTorch Conv1d layout.  Returns (B, C, L).

    w1f: (C_out, 3*C_in)  conv1 weight, taps fused, bn1 scale folded in.
    b1 : (C_out, 1)       bn1 shift.
    w2f: (C_out, 3*C_out) conv2 weight, taps fused, bn2 scale folded in.
    b2 : (C_out, 1)       bn2 shift.
    use_bf16_matmul: cast MXU operands to bf16 (f32 accumulation); recommended
      on v6e/v7x for C >= 16.  Relax comparison tolerance to ~1e-1 when on.
    """
    B, C_in, L = x_ncl.shape
    C_out = w1f.shape[0]
    assert C_in == C_out, "downsample=None path requires in_channels == out_channels"
    assert w1f.shape == (C_out, 3 * C_in)
    assert w2f.shape == (C_out, 3 * C_out)

    TB = _pick_tb(B, L, C_in, C_out)
    assert B % TB == 0
    N = TB * L

    # Layout plumbing: present a lane-dense (C, B*L) slab (batch folded into lanes).
    x_cn = jnp.transpose(x_ncl, (1, 0, 2)).reshape(C_in, B * L)

    matmul_dtype = jnp.bfloat16 if use_bf16_matmul else jnp.float32

    out_cn = pl.pallas_call(
        _make_kernel(C_in, C_out, L, TB, matmul_dtype),
        out_shape=jax.ShapeDtypeStruct((C_out, B * L), jnp.float32),
        grid_spec=pltpu.PrefetchScalarGridSpec(
            num_scalar_prefetch=0,
            grid=(B // TB,),
            in_specs=[
                pl.BlockSpec((C_in, N), lambda i: (0, i)),
                pl.BlockSpec((C_out, 3 * C_in), lambda i: (0, 0)),
                pl.BlockSpec((C_out, 3 * C_out), lambda i: (0, 0)),
                pl.BlockSpec((C_out, 1), lambda i: (0, 0)),
                pl.BlockSpec((C_out, 1), lambda i: (0, 0)),
            ],
            out_specs=pl.BlockSpec((C_out, N), lambda i: (0, i)),
        ),
        compiler_params=pltpu.CompilerParams(
            dimension_semantics=("parallel",),
            vmem_limit_bytes=32 * 1024 * 1024),
    )(x_cn, w1f, w2f, b1, b2)

    return jnp.transpose(out_cn.reshape(C_out, B, L), (1, 0, 2))


def fold_conv_bn(w_oik, gamma, beta, mean, var, eps=1e-5):
    """Fold inference-mode BatchNorm into a Conv1d(k=3, bias=False) weight.

    w_oik: (C_out, C_in, 3) in PyTorch layout.
    Returns (w_fused (C_out, 3*C_in) with column order [tap k][c_in],
             shift (C_out, 1)).
    """
    scale = gamma / jnp.sqrt(var + eps)
    shift = beta - mean * scale
    C_out, C_in, K = w_oik.shape
    w_fused = jnp.transpose(w_oik, (0, 2, 1)).reshape(C_out, K * C_in)
    w_fused = w_fused * scale[:, None]
    return w_fused, shift[:, None]


def _reference(x, w1_oik, w2_oik, bn1, bn2):
    """Pure-JAX reference mirroring the PyTorch forward (eval mode)."""
    def conv1d(x, w):
        return jax.lax.conv_general_dilated(
            x, w, window_strides=(1,), padding=((1, 1),),
            dimension_numbers=("NCH", "OIH", "NCH"))

    h = conv1d(x, w1_oik)
    h = h * bn1[0][None, :, None] + bn1[1][None, :, None]
    h = jnp.maximum(h, 0.0)
    h = conv1d(h, w2_oik)
    h = h * bn2[0][None, :, None] + bn2[1][None, :, None]
    return jnp.maximum(h + x, 0.0)


def _run_case(key, B, C, L, use_bf16_matmul, atol):
    ks = jax.random.split(key, 11)
    x = jax.random.normal(ks[0], (B, C, L), jnp.float32)

    # Conv weights in PyTorch layout (out, in, kernel)
    w1_oik = jax.random.normal(ks[1], (C, C, 3), jnp.float32) * 0.2
    w2_oik = jax.random.normal(ks[2], (C, C, 3), jnp.float32) * 0.2

    # BatchNorm parameters + running stats (inference mode)
    g1 = jax.random.uniform(ks[3], (C,), minval=0.5, maxval=1.5)
    be1 = jax.random.normal(ks[4], (C,)) * 0.1
    m1 = jax.random.normal(ks[5], (C,)) * 0.1
    v1 = jax.random.uniform(ks[6], (C,), minval=0.5, maxval=1.5)
    g2 = jax.random.uniform(ks[7], (C,), minval=0.5, maxval=1.5)
    be2 = jax.random.normal(ks[8], (C,)) * 0.1
    m2 = jax.random.normal(ks[9], (C,)) * 0.1
    v2 = jax.random.uniform(ks[10], (C,), minval=0.5, maxval=1.5)

    # One-time parameter prep: fuse taps + fold BN scale into weights.
    w1f, b1 = fold_conv_bn(w1_oik, g1, be1, m1, v1)
    w2f, b2 = fold_conv_bn(w2_oik, g2, be2, m2, v2)

    out = jax.block_until_ready(
        residual_block_pallas(x, w1f, b1, w2f, b2,
                              use_bf16_matmul=use_bf16_matmul))

    s1 = g1 / jnp.sqrt(v1 + 1e-5)
    s2 = g2 / jnp.sqrt(v2 + 1e-5)
    ref = jax.block_until_ready(
        _reference(x, w1_oik, w2_oik, (s1, be1 - m1 * s1), (s2, be2 - m2 * s2)))

    assert out.shape == (B, C, L)
    err = float(jnp.max(jnp.abs(out - ref)))
    assert err < atol, (B, C, L, use_bf16_matmul, err)


if __name__ == "__main__":
    key = jax.random.PRNGKey(0)
    k1, k2, k3 = jax.random.split(key, 3)

    # Tiny shape (single grid step, concat-halo fallback path), f32 matmul.
    _run_case(k1, B=2, C=8, L=16, use_bf16_matmul=False, atol=1e-4)
    # 128-aligned lanes (roll-halo path, 2-step parallel grid), f32 matmul.
    _run_case(k2, B=4, C=16, L=64, use_bf16_matmul=False, atol=1e-4)
    # Same shape, bf16 MXU operands (v6e/v7x fast path), f32 accumulation.
    _run_case(k3, B=4, C=16, L=64, use_bf16_matmul=True, atol=1e-1)

    print("KERNEL_OK")
</pallas_src>

<mosaic_0001>
module attributes {stable_mosaic.version = 11 : i64} {
  func.func @kernel(%arg0: i32, %arg1: memref<8x32xf32, #tpu.memory_space<vmem>>, %arg2: memref<8x24xf32, #tpu.memory_space<vmem>>, %arg3: memref<8x24xf32, #tpu.memory_space<vmem>>, %arg4: memref<8x1xf32, #tpu.memory_space<vmem>>, %arg5: memref<8x1xf32, #tpu.memory_space<vmem>>, %arg6: memref<8x32xf32, #tpu.memory_space<vmem>>) attributes {dimension_semantics = [#tpu.dimension_semantics<parallel>], iteration_bounds = array<i64: 1>, scalar_prefetch = 0 : i64, scratch_operands = 0 : i64, tpu.core_type = #tpu.core_type<tc>, window_params = [{transform_indices = @transform_0, window_bounds = array<i64: 8, 32>}, {pipeline_mode = #tpu.pipeline_mode<synchronous>, transform_indices = @transform_1, window_bounds = array<i64: 8, 24>}, {pipeline_mode = #tpu.pipeline_mode<synchronous>, transform_indices = @transform_2, window_bounds = array<i64: 8, 24>}, {pipeline_mode = #tpu.pipeline_mode<synchronous>, transform_indices = @transform_3, window_bounds = array<i64: 8, 1>}, {pipeline_mode = #tpu.pipeline_mode<synchronous>, transform_indices = @transform_4, window_bounds = array<i64: 8, 1>}, {transform_indices = @transform_5, window_bounds = array<i64: 8, 32>}]} {
    %c0 = arith.constant 0 : index
    %c0_0 = arith.constant 0 : index
    %0 = vector.load %arg1[%c0, %c0_0] : memref<8x32xf32, #tpu.memory_space<vmem>>, vector<8x32xf32>
    %1 = tpu.iota {dimensions = array<i32: 1>} : vector<8x32xi32>
    %c16_i32 = arith.constant 16 : i32
    %c0_i32 = arith.constant 0 : i32
    %2 = arith.cmpi eq, %c16_i32, %c0_i32 : i32
    %c1_i32 = arith.constant 1 : i32
    %3 = arith.select %2, %c1_i32, %c16_i32 : i32
    %4 = vector.broadcast %3 : i32 to vector<8x32xi32>
    %5 = arith.remsi %1, %4 : vector<8x32xi32>
    %c0_i32_1 = arith.constant 0 : i32
    %6 = vector.broadcast %c0_i32_1 : i32 to vector<8x32xi32>
    %7 = arith.cmpi ne, %5, %6 : vector<8x32xi32>
    %c0_i32_2 = arith.constant 0 : i32
    %8 = vector.broadcast %c0_i32_2 : i32 to vector<8x32xi32>
    %9 = arith.cmpi slt, %5, %8 : vector<8x32xi32>
    %c0_i32_3 = arith.constant 0 : i32
    %10 = arith.cmpi slt, %3, %c0_i32_3 : i32
    %11 = vector.broadcast %10 : i1 to vector<8x32xi1>
    %12 = vector.broadcast %11 : vector<8x32xi1> to vector<8x32xi1>
    %13 = arith.xori %9, %12 : vector<8x32xi1>
    %14 = arith.andi %13, %7 : vector<8x32xi1>
    %15 = vector.broadcast %3 : i32 to vector<8x32xi32>
    %16 = arith.addi %5, %15 : vector<8x32xi32>
    %17 = arith.select %14, %16, %5 : vector<8x32xi1>, vector<8x32xi32>
    %c0_i32_4 = arith.constant 0 : i32
    %18 = vector.broadcast %c0_i32_4 : i32 to vector<8x32xi32>
    %19 = arith.cmpi ne, %17, %18 : vector<8x32xi32>
    %c15_i32 = arith.constant 15 : i32
    %20 = vector.broadcast %c15_i32 : i32 to vector<8x32xi32>
    %21 = arith.cmpi ne, %17, %20 : vector<8x32xi32>
    %c0_5 = arith.constant 0 : index
    %c0_6 = arith.constant 0 : index
    %22 = vector.load %arg2[%c0_5, %c0_6] : memref<8x24xf32, #tpu.memory_space<vmem>>, vector<8x24xf32>
    %c0_7 = arith.constant 0 : index
    %c0_8 = arith.constant 0 : index
    %23 = vector.load %arg3[%c0_7, %c0_8] : memref<8x24xf32, #tpu.memory_space<vmem>>, vector<8x24xf32>
    %cst = arith.constant 0.000000e+00 : f32
    %24 = vector.broadcast %cst : f32 to vector<8x1xf32>
    %25 = vector.extract_strided_slice %0 {offsets = [0, 0], sizes = [8, 31], strides = [1, 1]} : vector<8x32xf32> to vector<8x31xf32>
    %26 = tpu.concatenate %24, %25 in 1 : vector<8x1xf32>, vector<8x31xf32> -> vector<8x32xf32>
    %27 = vector.extract_strided_slice %0 {offsets = [0, 1], sizes = [8, 31], strides = [1, 1]} : vector<8x32xf32> to vector<8x31xf32>
    %28 = tpu.concatenate %27, %24 in 1 : vector<8x31xf32>, vector<8x1xf32> -> vector<8x32xf32>
    %cst_9 = arith.constant 0.000000e+00 : f32
    %29 = vector.broadcast %cst_9 : f32 to vector<8x32xf32>
    %30 = arith.select %19, %26, %29 : vector<8x32xi1>, vector<8x32xf32>
    %cst_10 = arith.constant 0.000000e+00 : f32
    %31 = vector.broadcast %cst_10 : f32 to vector<8x32xf32>
    %32 = arith.select %21, %28, %31 : vector<8x32xi1>, vector<8x32xf32>
    %33 = tpu.concatenate %30, %0, %32 in 0 : vector<8x32xf32>, vector<8x32xf32>, vector<8x32xf32> -> vector<24x32xf32>
    %cst_11 = arith.constant dense<0.000000e+00> : vector<8x32xf32>
    %34 = tpu.matmul %22, %33, %cst_11 {dimension_numbers = #tpu.dot_dimension_numbers<[1], [0], [0], [1], [0, 0, 1, 1], [], []>} : vector<8x24xf32>, vector<24x32xf32>, vector<8x32xf32> -> vector<8x32xf32>
    %c0_12 = arith.constant 0 : index
    %c0_13 = arith.constant 0 : index
    %35 = vector.load %arg4[%c0_12, %c0_13] : memref<8x1xf32, #tpu.memory_space<vmem>>, vector<8x1xf32>
    %36 = vector.broadcast %35 : vector<8x1xf32> to vector<8x32xf32>
    %37 = arith.addf %34, %36 : vector<8x32xf32>
    %cst_14 = arith.constant 0.000000e+00 : f32
    %38 = vector.broadcast %cst_14 : f32 to vector<8x32xf32>
    %39 = arith.maximumf %37, %38 : vector<8x32xf32>
    %cst_15 = arith.constant 0.000000e+00 : f32
    %40 = vector.broadcast %cst_15 : f32 to vector<8x1xf32>
    %41 = vector.extract_strided_slice %39 {offsets = [0, 0], sizes = [8, 31], strides = [1, 1]} : vector<8x32xf32> to vector<8x31xf32>
    %42 = tpu.concatenate %40, %41 in 1 : vector<8x1xf32>, vector<8x31xf32> -> vector<8x32xf32>
    %43 = vector.extract_strided_slice %39 {offsets = [0, 1], sizes = [8, 31], strides = [1, 1]} : vector<8x32xf32> to vector<8x31xf32>
    %44 = tpu.concatenate %43, %40 in 1 : vector<8x31xf32>, vector<8x1xf32> -> vector<8x32xf32>
    %cst_16 = arith.constant 0.000000e+00 : f32
    %45 = vector.broadcast %cst_16 : f32 to vector<8x32xf32>
    %46 = arith.select %19, %42, %45 : vector<8x32xi1>, vector<8x32xf32>
    %cst_17 = arith.constant 0.000000e+00 : f32
    %47 = vector.broadcast %cst_17 : f32 to vector<8x32xf32>
    %48 = arith.select %21, %44, %47 : vector<8x32xi1>, vector<8x32xf32>
    %49 = tpu.concatenate %46, %39, %48 in 0 : vector<8x32xf32>, vector<8x32xf32>, vector<8x32xf32> -> vector<24x32xf32>
    %cst_18 = arith.constant dense<0.000000e+00> : vector<8x32xf32>
    %50 = tpu.matmul %23, %49, %cst_18 {dimension_numbers = #tpu.dot_dimension_numbers<[1], [0], [0], [1], [0, 0, 1, 1], [], []>} : vector<8x24xf32>, vector<24x32xf32>, vector<8x32xf32> -> vector<8x32xf32>
    %c0_19 = arith.constant 0 : index
    %c0_20 = arith.constant 0 : index
    %51 = vector.load %arg5[%c0_19, %c0_20] : memref<8x1xf32, #tpu.memory_space<vmem>>, vector<8x1xf32>
    %52 = vector.broadcast %51 : vector<8x1xf32> to vector<8x32xf32>
    %53 = arith.addf %50, %52 : vector<8x32xf32>
    %54 = arith.addf %53, %0 : vector<8x32xf32>
    %cst_21 = arith.constant 0.000000e+00 : f32
    %55 = vector.broadcast %cst_21 : f32 to vector<8x32xf32>
    %56 = arith.maximumf %54, %55 : vector<8x32xf32>
    %c0_22 = arith.constant 0 : index
    %c0_23 = arith.constant 0 : index
    %57 = vector.load %arg6[%c0_22, %c0_23] : memref<8x32xf32, #tpu.memory_space<vmem>>, vector<8x32xf32>
    tpu.vector_store %arg6[%c0_22, %c0_23], %56 {strides = array<i32>} : memref<8x32xf32, #tpu.memory_space<vmem>>, vector<8x32xf32>,
    return
  }
  func.func @transform_0(%arg0: i32) -> (i32, i32) {
    %c0_i32 = arith.constant 0 : i32
    %c0_i32_0 = arith.constant 0 : i32
    return %c0_i32, %arg0 : i32, i32
  }
  func.func @transform_1(%arg0: i32) -> (i32, i32) {
    %c0_i32 = arith.constant 0 : i32
    %c0_i32_0 = arith.constant 0 : i32
    %c0_i32_1 = arith.constant 0 : i32
    return %c0_i32, %c0_i32_0 : i32, i32
  }
  func.func @transform_2(%arg0: i32) -> (i32, i32) {
    %c0_i32 = arith.constant 0 : i32
    %c0_i32_0 = arith.constant 0 : i32
    %c0_i32_1 = arith.constant 0 : i32
    return %c0_i32, %c0_i32_0 : i32, i32
  }
  func.func @transform_3(%arg0: i32) -> (i32, i32) {
    %c0_i32 = arith.constant 0 : i32
    %c0_i32_0 = arith.constant 0 : i32
    %c0_i32_1 = arith.constant 0 : i32
    return %c0_i32, %c0_i32_0 : i32, i32
  }
  func.func @transform_4(%arg0: i32) -> (i32, i32) {
    %c0_i32 = arith.constant 0 : i32
    %c0_i32_0 = arith.constant 0 : i32
    %c0_i32_1 = arith.constant 0 : i32
    return %c0_i32, %c0_i32_0 : i32, i32
  }
  func.func @transform_5(%arg0: i32) -> (i32, i32) {
    %c0_i32 = arith.constant 0 : i32
    %c0_i32_0 = arith.constant 0 : i32
    return %c0_i32, %arg0 : i32, i32
  }
}

</mosaic_0001>

<bundles_post_ra>
// kernel: residual_block_pallas.1
= control target key start
LH: loop header
LB: loop body
LE: loop exit
PB: predicated region body
PF: predicated region fallthrough
CT: control target
= control target key end

     0   :  { %v280_v1 = vmov 0.0|0.0   ;;  %s281_s20 = smov 1   ;;  %vm282_vm0 = vmmov 0   ;;  %v283_v2 = vmov 0.0   ;;  %v284_v4 = vmov 0   ;;  %s365_s0 = inlined_call_operand.vmem [shape: f32[8,32], index: 0, kind: input, shape index: {}]   ;;  %s366_s3 = inlined_call_operand.vmem [shape: f32[8,1], index: 3, kind: input, shape index: {}]   ;;  %s367_s1 = inlined_call_operand.vmem [shape: f32[8,24], index: 1, kind: input, shape index: {}]   ;;  %s368_s4 = inlined_call_operand.vmem [shape: f32[8,1], index: 4, kind: input, shape index: {}]   ;;  %s369_s2 = inlined_call_operand.vmem [shape: f32[8,24], index: 2, kind: input, shape index: {}]   ;;  %s370_s5 = inlined_call_operand.vmem [shape: f32[8,32], index: 5, kind: output, shape index: {}]  }
   0x1   :  { %v320_v0 = vld [vmem:[%s365_s0] sm:$0xff]  ;;  %263 = vmatprep.subr.bf16.mxu0 %v280_v1  ;;  %267 = vmatprep.subr.bf16.mxu1 %v280_v1  ;;  %s285_s0 = smov 127   ;;  %v21_v5 = vlaneseq  ;;  %vm43_vm1 = vcmask 7168   ;;  %vm286_vm3 = vmmov 1   ;;  %vm48_vm5 = vcmask 252928  }
   0x2   :  { %40 = vrot.lane.b32.xlu0 %v320_v0, %s281_s20  ;;  %251 = vmatprep.mubr.msk.f32.mxu0 %vm282_vm0, %v283_v2  ;;  %v52_v3 = vld [vmem:[%s366_s3] sm:$0xff]  ;;  %vm58_vm7 = vcmask 195584   ;;  %vm225_vm8 = vcmask 261120  }
   0x3   :  { %278 = vset.pattern.permute.xlu1 %v284_v4  ;;  %260 = vmatprep.mubr.msk.f32.mxu1 %vm282_vm0, %v283_v2  ;;  %v22_v6 = vand.u32 127, %v21_v5  ;;  %v37_v15 = vld [vmem:[%s367_s1] sm:$0xff] }
   0x4   :  { %55 = vperm.xlu1 %278, %v52_v3   ;;  %279 = vset.pattern.permute.xlu0 %v284_v4  ;;  %v144_v21 = vld [vmem:[%s368_s4] sm:$0xff] }
   0x5   :  { %v27_v7 = vand.u32 15, %v22_v6  ;;  %v38_v26 = vld [vmem:[%s369_s2] sm:$0xff] }
   0x6   :  { %45 = vrot.lane.b32.xlu0 %v320_v0, %s285_s0 }
   0x7   :  { %vm35_vm2 = vcmp.ne.s32.totalorder %v27_v7, 0  ;;  %vm337_vm6 = vcmp.ne.s32.totalorder %v27_v7, 15 }
   0x8   :  { %vm329_vm4 = vmpackc.low %vm286_vm3, %vm35_vm2 }
  0x74   :  { %v41_v8 = vpop.permute.xlu0 %40 }
  0x75   :  { %v44_v9 = vsel %vm43_vm1, 0.0, %v41_v8 }
  0x76   :  { %v264_v11 = vpack.c.bf16 %v320_v0, %v44_v9 }
  0x78   :  { %266 = vmatpush3.bf16.msk.msra.mxu0 %vm329_vm4, %v264_v11  ;;  %v46_v12 = vpop.permute.xlu0 %45 }
  0x79   :  { %v49_v13 = vsel %vm48_vm5, %v46_v12, 0.0  ;;  %249 = vmatprep.subr.mxu0 %v283_v2 }
  0x7c   :  { %250 = vmatpush3.msk.msra.mxu0 %vm337_vm6, %v49_v13 }
  0x7d   :  { %252 = vmatmul.mubr.msk.f32.vlgmr.msra.gmra.mrb[0].mxu0 %vm58_vm7, %v37_v15 }
  0x83   :  { %v56_v16 = vpop.permute.xlu1 %55 }
 0x150   :  { %v128_v17 = vpop.f32.mrb[0].mxu0 }
 0x151   :  { %v129_v18 = vadd.f32 %v128_v17, %v56_v16  ;;  %v253_v19 = vpop.f32.mrb[1].mxu0 }
 0x153   :  { %v132_v20 = vmax.f32 %v129_v18, 0.0 }
 0x155   :  { %138 = vrot.lane.b32.xlu0 %v132_v20, %s285_s0  ;;  %134 = vrot.lane.b32.xlu1 %v132_v20, %s281_s20 }
 0x159   :  { %147 = vperm.xlu1 %278, %v144_v21  }
 0x1c7   :  { %v135_v22 = vpop.permute.xlu1 %134  ;;  %v139_v25 = vpop.permute.xlu0 %138 }
 0x1c8   :  { %v137_v23 = vsel %vm43_vm1, 0.0, %v135_v22  ;;  %v141_v27 = vsel %vm48_vm5, %v139_v25, 0.0 }
 0x1c9   :  { %v268_v24 = vpack.c.bf16 %v132_v20, %v137_v23 }
 0x1cb   :  { %270 = vmatpush3.bf16.msk.msra.mxu1 %vm329_vm4, %v268_v24 }
 0x1cc   :  { %258 = vmatprep.subr.mxu1 %v283_v2 }
 0x1cf   :  { %259 = vmatpush3.msk.msra.mxu1 %vm337_vm6, %v141_v27 }
 0x1d0   :  { %261 = vmatmul.mubr.msk.f32.vlgmr.msra.gmra.mrb[0].mxu1 %vm58_vm7, %v38_v26 }
 0x1d8   :  { %v148_v28 = vpop.permute.xlu1 %147 }
 0x2a3   :  { %v219_v29 = vpop.f32.mrb[0].mxu1 }
 0x2a4   :  { %v220_v30 = vadd.f32 %v219_v29, %v148_v28  ;;  %v262_v31 = vpop.f32.mrb[1].mxu1 }
 0x2a6   :  { %v223_v32 = vadd.f32 %v220_v30, %v320_v0 }
 0x2a8   :  { %v224_v33 = vmax.f32 %v223_v32, 0.0 }
 0x2aa   :  { %226 = vst.msk [vmem:[%s370_s5] sm:$0xff] %vm225_vm8, %v224_v33 }

</bundles_post_ra>
